<compile_context>
chip_gen: v7x
topology: tpu7x:2x2x1
jax: 0.10.0
libtpu: 0.0.40
codegen_flags: <defaults>
</compile_context>

<pallas_src>
import jax
import jax.numpy as jnp
from jax.experimental import pallas as pl
from jax.experimental.pallas import tpu as pltpu


def _round_up(n, m):
    return ((n + m - 1) // m) * m


def mlp_kernel(xt_ref, w1t_ref, b1_ref, w2_ref, b2_ref, o_ref):
    """Transposed (lane-dense) forward for one batch tile.

    xt_ref : [F, TB]   input tile, batch on the 128-lane axis
    w1t_ref: [H, F]    first-layer weight (pre-transposed), resident across grid steps
    b1_ref : [H, 1]    first-layer bias (lane-broadcast)
    w2_ref : [H, 1]    second-layer weight column (n_output == 1)
    b2_ref : (1,) SMEM second-layer bias scalar
    o_ref  : [1, TB]   output tile (lane-dense)
    """
    # Hidden layer on the MXU: H^T = W1^T @ X^T with f32 accumulation.
    ht = jnp.dot(w1t_ref[...], xt_ref[...], preferred_element_type=jnp.float32)
    ht = jnp.maximum(ht + b1_ref[...], 0.0)                  # bias + ReLU on the VPU
    # Output layer (n_output == 1): VPU multiply + sublane reduce instead of a
    # nearly-empty [*,H]x[H,1] MXU pass.  (For n_output > 1 this would be a jnp.dot.)
    y = jnp.sum(ht * w2_ref[...], axis=0, keepdims=True)     # [1, TB]
    o_ref[...] = (y + b2_ref[0]).astype(o_ref.dtype)


def net_forward(x, w1, b1, w2, b2, *, batch_tile=512):
    """forward(x) = Linear(n_hidden, 1)(relu(Linear(n_features, n_hidden)(x)))

    x : [B, F]; w1: [F, H]; b1: [H] or [1, H]; w2: [H, 1]; b2: [1] or [1, 1]
    returns [B, 1]
    """
    B, F = x.shape
    Fw, H = w1.shape
    assert Fw == F, "w1 must be [n_features, n_hidden]"
    n_output = w2.shape[-1]
    assert n_output == 1, "kernel is specialized for n_output == 1 (regression head)"

    # Lane-dense layout: put batch on the last (lane) axis of every array.
    w1t = jnp.transpose(w1)                              # [H, F]
    b1c = jnp.reshape(b1, (H, 1)).astype(jnp.float32)    # [H, 1]
    w2c = jnp.reshape(w2, (H, 1)).astype(jnp.float32)    # [H, 1]
    b2s = jnp.reshape(b2, (1,)).astype(jnp.float32)      # scalar -> SMEM

    # Batch tile: a multiple of the 128-lane width; pad B up to a whole tile.
    tb = int(batch_tile) if B >= batch_tile else _round_up(B, 128)
    b_pad = _round_up(B, tb)
    xt = jnp.zeros((F, b_pad), x.dtype).at[:, :B].set(jnp.transpose(x))

    out_t = pl.pallas_call(
        mlp_kernel,
        out_shape=jax.ShapeDtypeStruct((1, b_pad), x.dtype),
        grid_spec=pltpu.PrefetchScalarGridSpec(
            num_scalar_prefetch=0,
            grid=(b_pad // tb,),
            in_specs=[
                pl.BlockSpec((F, tb), lambda i: (0, i)),   # x^T : tiled over batch
                pl.BlockSpec((H, F), lambda i: (0, 0)),    # W1^T: resident in VMEM
                pl.BlockSpec((H, 1), lambda i: (0, 0)),    # b1  : resident in VMEM
                pl.BlockSpec((H, 1), lambda i: (0, 0)),    # w2  : resident in VMEM
                pl.BlockSpec(memory_space=pltpu.MemorySpace.SMEM),  # b2 scalar in SMEM
            ],
            out_specs=pl.BlockSpec((1, tb), lambda i: (0, i)),
        ),
        compiler_params=pltpu.CompilerParams(
            dimension_semantics=("parallel",),  # shard batch tiles across v7x's 2 TCs
        ),
    )(xt, w1t, b1c, w2c, b2s)

    return jnp.transpose(out_t[:, :B])   # back to [B, 1]


if __name__ == "__main__":
    # Shapes implied by the module / data pipeline: PCA(n_components=20) -> 20 features.
    n_features, n_hidden, n_output = 20, 32, 1

    key = jax.random.PRNGKey(0)
    kx, k1, kb1, k2, kb2 = jax.random.split(key, 5)

    # torch.nn.Linear-style uniform(-1/sqrt(fan_in), 1/sqrt(fan_in)) init.
    bound1 = 1.0 / float(n_features) ** 0.5
    bound2 = 1.0 / float(n_hidden) ** 0.5
    w1 = jax.random.uniform(k1, (n_features, n_hidden), jnp.float32, -bound1, bound1)
    b1 = jax.random.uniform(kb1, (n_hidden,), jnp.float32, -bound1, bound1)
    w2 = jax.random.uniform(k2, (n_hidden, n_output), jnp.float32, -bound2, bound2)
    b2 = jax.random.uniform(kb2, (n_output,), jnp.float32, -bound2, bound2)

    def ref_forward(xv):
        return jnp.maximum(xv @ w1 + b1[None, :], 0.0) @ w2 + b2[None, :]

    # Small DataLoader-style minibatch (single grid step, padded to one 128-lane tile).
    x_small = jax.random.normal(kx, (8, n_features), dtype=jnp.float32)
    out_small = net_forward(x_small, w1, b1, w2, b2)
    jax.block_until_ready(out_small)
    assert out_small.shape == (8, n_output)
    assert jnp.allclose(out_small, ref_forward(x_small), atol=1e-5, rtol=1e-5)

    # Larger ragged batch: exercises padding + a multi-step "parallel" batch grid
    # with weights resident in VMEM across steps.
    x_big = jax.random.normal(kx, (1000, n_features), dtype=jnp.float32)
    out_big = net_forward(x_big, w1, b1, w2, b2, batch_tile=256)
    jax.block_until_ready(out_big)
    assert out_big.shape == (1000, n_output)
    assert jnp.allclose(out_big, ref_forward(x_big), atol=1e-5, rtol=1e-5)

    print("KERNEL_OK")
</pallas_src>

<mosaic_0001>
module attributes {stable_mosaic.version = 11 : i64} {
  func.func @mlp_kernel(%arg0: i32, %arg1: memref<20x128xf32, #tpu.memory_space<vmem>>, %arg2: memref<32x20xf32, #tpu.memory_space<vmem>>, %arg3: memref<32x1xf32, #tpu.memory_space<vmem>>, %arg4: memref<32x1xf32, #tpu.memory_space<vmem>>, %arg5: memref<1xf32, #tpu.memory_space<smem>>, %arg6: memref<1x128xf32, #tpu.memory_space<vmem>>) attributes {dimension_semantics = [#tpu.dimension_semantics<parallel>], iteration_bounds = array<i64: 1>, scalar_prefetch = 0 : i64, scratch_operands = 0 : i64, tpu.core_type = #tpu.core_type<tc>, window_params = [{transform_indices = @transform_0, window_bounds = array<i64: 20, 128>}, {pipeline_mode = #tpu.pipeline_mode<synchronous>, transform_indices = @transform_1, window_bounds = array<i64: 32, 20>}, {pipeline_mode = #tpu.pipeline_mode<synchronous>, transform_indices = @transform_2, window_bounds = array<i64: 32, 1>}, {pipeline_mode = #tpu.pipeline_mode<synchronous>, transform_indices = @transform_3, window_bounds = array<i64: 32, 1>}, {transform_indices = @transform_4, window_bounds = array<i64: 1>}, {transform_indices = @transform_5, window_bounds = array<i64: 1, 128>}]} {
    %c0 = arith.constant 0 : index
    %c0_0 = arith.constant 0 : index
    %0 = vector.load %arg2[%c0, %c0_0] : memref<32x20xf32, #tpu.memory_space<vmem>>, vector<32x20xf32>
    %c0_1 = arith.constant 0 : index
    %c0_2 = arith.constant 0 : index
    %1 = vector.load %arg1[%c0_1, %c0_2] : memref<20x128xf32, #tpu.memory_space<vmem>>, vector<20x128xf32>
    %cst = arith.constant dense<0.000000e+00> : vector<32x128xf32>
    %2 = tpu.matmul %0, %1, %cst {dimension_numbers = #tpu.dot_dimension_numbers<[1], [0], [0], [1], [0, 0, 1, 1], [], []>} : vector<32x20xf32>, vector<20x128xf32>, vector<32x128xf32> -> vector<32x128xf32>
    %c0_3 = arith.constant 0 : index
    %c0_4 = arith.constant 0 : index
    %3 = vector.load %arg3[%c0_3, %c0_4] : memref<32x1xf32, #tpu.memory_space<vmem>>, vector<32x1xf32>
    %4 = vector.broadcast %3 : vector<32x1xf32> to vector<32x128xf32>
    %5 = arith.addf %2, %4 : vector<32x128xf32>
    %cst_5 = arith.constant 0.000000e+00 : f32
    %6 = vector.broadcast %cst_5 : f32 to vector<32x128xf32>
    %7 = arith.maximumf %5, %6 : vector<32x128xf32>
    %c0_6 = arith.constant 0 : index
    %c0_7 = arith.constant 0 : index
    %8 = vector.load %arg4[%c0_6, %c0_7] : memref<32x1xf32, #tpu.memory_space<vmem>>, vector<32x1xf32>
    %9 = vector.broadcast %8 : vector<32x1xf32> to vector<32x128xf32>
    %10 = arith.mulf %7, %9 : vector<32x128xf32>
    %cst_8 = arith.constant dense<0.000000e+00> : vector<128xf32>
    %11 = vector.multi_reduction <add>, %10, %cst_8 [0] : vector<32x128xf32> to vector<128xf32>
    %12 = vector.shape_cast %11 : vector<128xf32> to vector<1x128xf32>
    %c0_9 = arith.constant 0 : index
    %13 = memref.load %arg5[%c0_9] : memref<1xf32, #tpu.memory_space<smem>>
    %14 = vector.broadcast %13 : f32 to vector<1x128xf32>
    %15 = arith.addf %12, %14 : vector<1x128xf32>
    %c0_10 = arith.constant 0 : index
    %c0_11 = arith.constant 0 : index
    %16 = vector.load %arg6[%c0_10, %c0_11] : memref<1x128xf32, #tpu.memory_space<vmem>>, vector<1x128xf32>
    tpu.vector_store %arg6[%c0_10, %c0_11], %15 {strides = array<i32>} : memref<1x128xf32, #tpu.memory_space<vmem>>, vector<1x128xf32>,
    return
  }
  func.func @transform_0(%arg0: i32) -> (i32, i32) {
    %c0_i32 = arith.constant 0 : i32
    %c0_i32_0 = arith.constant 0 : i32
    return %c0_i32, %arg0 : i32, i32
  }
  func.func @transform_1(%arg0: i32) -> (i32, i32) {
    %c0_i32 = arith.constant 0 : i32
    %c0_i32_0 = arith.constant 0 : i32
    %c0_i32_1 = arith.constant 0 : i32
    return %c0_i32, %c0_i32_0 : i32, i32
  }
  func.func @transform_2(%arg0: i32) -> (i32, i32) {
    %c0_i32 = arith.constant 0 : i32
    %c0_i32_0 = arith.constant 0 : i32
    %c0_i32_1 = arith.constant 0 : i32
    return %c0_i32, %c0_i32_0 : i32, i32
  }
  func.func @transform_3(%arg0: i32) -> (i32, i32) {
    %c0_i32 = arith.constant 0 : i32
    %c0_i32_0 = arith.constant 0 : i32
    %c0_i32_1 = arith.constant 0 : i32
    return %c0_i32, %c0_i32_0 : i32, i32
  }
  func.func @transform_4(%arg0: i32) -> i32 {
    %c0_i32 = arith.constant 0 : i32
    %c0_i32_0 = arith.constant 0 : i32
    return %c0_i32 : i32
  }
  func.func @transform_5(%arg0: i32) -> (i32, i32) {
    %c0_i32 = arith.constant 0 : i32
    %c0_i32_0 = arith.constant 0 : i32
    return %c0_i32, %arg0 : i32, i32
  }
}

</mosaic_0001>

<bundles_post_ra>
// kernel: tpu_custom_call.1
= control target key start
LH: loop header
LB: loop body
LE: loop exit
PB: predicated region body
PF: predicated region fallthrough
CT: control target
= control target key end

     0   :  { %vm53_vm0 = vcmask 162816   ;;  %vm66_vm1 = vcmask 1043456   ;;  %s374_s0 = inlined_call_operand.vmem [shape: f32[20,128], index: 0, kind: input, shape index: {}]   ;;  %s375_s1 = inlined_call_operand.vmem [shape: f32[32,20], index: 1, kind: input, shape index: {}]   ;;  %s376_s2 = inlined_call_operand.vmem [shape: f32[32,1], index: 2, kind: input, shape index: {}]   ;;  %s377_s3 = inlined_call_operand.vmem [shape: f32[32,1], index: 3, kind: input, shape index: {}]   ;;  %s378_s4 = inlined_call_operand.<no memory space> [shape: f32[1], index: 4, kind: input, shape index: {}]   ;;  %s379_s5 = inlined_call_operand.hbm [shape: f32[1,128], index: 5, kind: output, shape index: {}]  }
   0x1   :  { %v26_v0 = vld [vmem:[%s374_s0] sm:$0xff]  ;;  %v27_v1 = vld [vmem:[%s374_s0 + $0x8] sm:$0xff]  ;;  %v24_v4 = vld [vmem:[%s375_s1 + $0x10] sm:$0xff] }
   0x2   :  { %v238_v2 = vpack.c.bf16 %v27_v1, %v26_v0  ;;  %v22_v3 = vld [vmem:[%s375_s1] sm:$0xff]  ;;  %v28_v5 = vld [vmem:[%s374_s0 + $0x10] sm:$0xf]  ;;  %235 = vmatprep.mubr.msk.f32.mxu1 %vm53_vm0, %v24_v4 }
   0x3   :  { %232 = vmatprep.mubr.msk.f32.mxu0 %vm53_vm0, %v22_v3  ;;  %v29_v6 = vld [vmem:[%s376_s2] sm:$0xff]  ;;  %v31_v7 = vld [vmem:[%s376_s2 + $0x10] sm:$0xff] }
   0x4   :  { %239 = vmatprep.subr.bf16.mxu0 %v238_v2  ;;  %242 = vmatprep.subr.bf16.mxu1 %v238_v2 }
   0x5   :  { %241 = vmatpush3.bf16.msra.mxu0 %v238_v2  ;;  %244 = vmatpush3.bf16.msra.mxu1 %v238_v2 }
   0x6   :  { %230 = vmatprep.subr.msk.mxu0 %vm66_vm1, %v28_v5  ;;  %243 = vmatprep.subr.msk.mxu1 %vm66_vm1, %v28_v5 }
   0x7   :  { %11 = vsyncpa [#allocation4], 0  ;;  %v23_v8 = vld [vmem:[%s375_s1 + $0x8] sm:$0xff]  ;;  %v25_v9 = vld [vmem:[%s375_s1 + $0x18] sm:$0xff]  ;;  %v274_v10 = vmov 0   ;;  %v197_v49 = vstv %s378_s4  ;;  %s275_s21 = smov [#allocation3]  }
   0x8   :  { %248 = vset.pattern.permute.xlu0 %v274_v10  ;;  %249 = vset.pattern.permute.xlu1 %v274_v10  ;;  %v30_v11 = vld [vmem:[%s376_s2 + $0x8] sm:$0xff]  ;;  %v32_v12 = vld [vmem:[%s376_s2 + $0x18] sm:$0xff]  ;;  %v159_v13 = vld [vmem:[%s377_s3] sm:$0xff]  ;;  %s206_s22 = sshll.u32 %s275_s21, 4  ;;  %s207_s22 = int_to_ptr.vmem [resolvable:$true] %s206_s22 }
   0x9   :  { %35 = vperm.xlu0 %248, %v29_v6   ;;  %45 = vperm.xlu1 %249, %v31_v7   ;;  %v160_v14 = vld [vmem:[%s377_s3 + $0x8] sm:$0xff]  ;;  %v161_v15 = vld [vmem:[%s377_s3 + $0x10] sm:$0xff]  ;;  %v162_v16 = vld [vmem:[%s377_s3 + $0x18] sm:$0xff]  ;;  %s250_s23 = scalar_lea.vmem %s207_s22, 16  ;;  %s254_s24 = scalar_lea.vmem %s207_s22, 32 }
   0xa   :  { %231 = vmatpush3.msk.msra.mxu0 %vm66_vm1, %v28_v5  ;;  %245 = vmatpush3.msk.msra.mxu1 %vm66_vm1, %v28_v5  ;;  %p251_p0 = scmp.ne.s32.totalorder %s207_s22, %s250_s23  ;;  %p255_p1 = scmp.lt.s32.totalorder %s207_s22, %s207_s22 }
   0xb   :  { %233 = vmatmul.mubr.msk.f32.vlgmr.msra.gmra.mrb[0].mxu0 %vm53_vm0, %v23_v8  ;;  %236 = vmatmul.mubr.msk.f32.vlgmr.msra.gmra.mrb[0].mxu1 %vm53_vm0, %v25_v9  ;;  %p256_p2 = scmp.lt.s32.totalorder %s254_s24, %s250_s23 }
   0xd   :  { %40 = vperm.xlu0 %248, %v30_v11   ;;  %50 = vperm.xlu1 %249, %v32_v12   ;;  %p257_p3 = por %p256_p2, %p255_p1 }
   0xf   :  { %p258_p4 = pnand %p257_p3, %p251_p0 }
  0x11   :  { %165 = vperm.xlu0 %248, %v159_v13   ;;  %170 = vperm.xlu1 %249, %v160_v14  }
  0x15   :  { %175 = vperm.xlu0 %248, %v161_v15   ;;  %180 = vperm.xlu1 %249, %v162_v16  }
  0x88   :  { %v36_v17 = vpop.permute.xlu0 %35  ;;  %v46_v18 = vpop.permute.xlu1 %45 }
  0x8c   :  { %v41_v19 = vpop.permute.xlu0 %40  ;;  %v51_v20 = vpop.permute.xlu1 %50 }
  0x90   :  { %v166_v21 = vpop.permute.xlu0 %165  ;;  %v171_v30 = vpop.permute.xlu1 %170 }
  0x94   :  { %v176_v37 = vpop.permute.xlu0 %175  ;;  %v181_v40 = vpop.permute.xlu1 %180 }
  0xde   :  { %v234_v22 = vpop.f32.mrb[0].mxu0  ;;  %v237_v23 = vpop.f32.mrb[0].mxu1 }
  0xdf   :  { %v142_v24 = vadd.f32 %v234_v22, %v41_v19  ;;  %v136_v25 = vpop.f32.mrb[1].mxu0  ;;  %v146_v26 = vpop.f32.mrb[1].mxu1  ;;  %v152_v27 = vadd.f32 %v237_v23, %v51_v20 }
  0xe0   :  { %v137_v28 = vadd.f32 %v136_v25, %v36_v17  ;;  %v147_v29 = vadd.f32 %v146_v26, %v46_v18 }
  0xe1   :  { %v156_v31 = vmax.f32 %v142_v24, 0.0  ;;  %v158_v35 = vmax.f32 %v152_v27, 0.0 }
  0xe2   :  { %v155_v32 = vmax.f32 %v137_v28, 0.0  ;;  %v157_v33 = vmax.f32 %v147_v29, 0.0 }
  0xe3   :  { %v184_v34 = vmul.f32 %v171_v30, %v156_v31  ;;  %v186_v41 = vmul.f32 %v181_v40, %v158_v35 }
  0xe4   :  { %v183_v36 = vmul.f32 %v166_v21, %v155_v32  ;;  %v185_v39 = vmul.f32 %v176_v37, %v157_v33 }
  0xe6   :  { %v187_v38 = vadd.f32 %v184_v34, %v183_v36 }
  0xe8   :  { %v188_v42 = vadd.f32 %v187_v38, %v185_v39 }
  0xea   :  { %v189_v43 = vadd.f32 %v188_v42, %v186_v41 }
  0xec   :  { %v190_v44 = vrot.slane %v189_v43, 4 }
  0xee   :  { %v191_v45 = vadd.f32 %v190_v44, %v189_v43 }
  0xf0   :  { %v192_v46 = vrot.slane %v191_v45, 2 }
  0xf2   :  { %v193_v47 = vadd.f32 %v192_v46, %v191_v45 }
  0xf4   :  { %v194_v48 = vrot.slane %v193_v47, 1 }
  0xf6   :  { %v195_v50 = vadd.f32 %v194_v48, %v193_v47 }
  0xf8   :  { %v198_v51 = vadd.f32 %v197_v49, %v195_v50 }
  0xfa   :  { %199 = vst [vmem:[#allocation3] sm:$0x1] %v198_v51 }
  0xfb   :  { %261 = shalt.err (!%p258_p4)
}
  0xfc   :  { %s262_s27 = scalar_lea.hbm %s379_s5, 16 }
  0xfd   :  { %p263_p5 = scmp.ne.s32.totalorder %s379_s5, %s262_s27  ;;  %p266_p6 = scmp.lt.u32.totalorder %s262_s27, %s379_s5 }
  0xff   :  { %p268_p7 = pnand %p266_p6, %p263_p5 }
 0x101   :  { %271 = shalt.err (!%p268_p7)
}
 0x102   :  { %209 = dma.vmem_to_hbm [thread:$0]  %s207_s22, 16, %s379_s5, [#allocation4]  }
 0x103   :  { %272 = dma.done.wait [#allocation4], 16  }
 0x104   :  { %273 = vsyncadd [#allocation4], 4294967280 }
 0x105   :  { %213 = vsyncpa [#allocation4], 1 }

</bundles_post_ra>
